<compile_context>
chip_gen: v5e
topology: v5e:2x2
jax: 0.10.0
libtpu: 0.0.40
codegen_flags: <defaults>
</compile_context>

<pallas_src>
import functools

import numpy as np

import jax
import jax.numpy as jnp
from jax.experimental import pallas as pl
from jax.experimental.pallas import tpu as pltpu


def _build_tap_masks(H, W):
    """(9, H*W) f32 {0,1}: for tap t=kh*3+kw, 1 where the (kh-1, kw-1) source
    pixel lies inside the image (realizes the conv's zero padding)."""
    h = np.arange(H)[:, None]
    w = np.arange(W)[None, :]
    masks = []
    for kh in range(3):
        for kw in range(3):
            dh, dw = kh - 1, kw - 1
            valid = (h + dh >= 0) & (h + dh < H) & (w + dw >= 0) & (w + dw < W)
            masks.append(valid.reshape(-1))
    return jnp.asarray(np.stack(masks, axis=0).astype(np.float32))


def _flow_pair_kernel(xa_ref, xb_ref, mask_ref, w1_ref, b1_ref, w2_ref, b2_ref,
                      o_ref, *, H, W, hidden):
    """Fused conv3x3 -> ReLU -> conv3x3 for ONE frame pair.

    xa_ref, xb_ref : (C, H*W)    f32   the two frames, native channel-major
    mask_ref       : (9, H*W)    f32   precomputed per-tap edge masks
    w1_ref         : (HID, 9*2C) bf16  conv1 weights, K-packed over the taps
    b1_ref         : (HID, 1)    f32
    w2_ref         : (9, 2, HID) bf16  conv2 weights, one slab per tap
    b2_ref         : (2, 1)      f32
    o_ref          : (2, H*W)    f32   lane-dense output
    """
    HW = H * W
    # (C, 2) -> 2C channel interleave happens here (a sublane concat of two
    # resident VMEM tiles), not as a full-video pass on the host.
    x = jnp.concatenate([xa_ref[...], xb_ref[...]], axis=0)        # (2C, HW) f32
    masks = mask_ref[...]                                          # (9, HW)  f32

    def tap(a, t):
        # Column m of the result holds the (kh-1, kw-1)-neighbour of pixel m,
        # zero outside the image.  Lanes that wrap around in the roll are
        # always masked because |shift| <= W+1 < H*W (requires H, W >= 2).
        dh, dw = t // 3 - 1, t % 3 - 1
        s = dh * W + dw
        shifted = a if s == 0 else pltpu.roll(a, shift=(-s) % HW, axis=1)
        return shifted * masks[t:t + 1, :]

    # conv1: one K-packed MXU matmul (M = hidden, K = 9*2C).  Roll/mask math
    # stays f32 (v5e VPU has no bf16); cast right before the dot.
    patches1 = jnp.concatenate([tap(x, t) for t in range(9)], axis=0)
    hid = jnp.dot(w1_ref[...], patches1.astype(jnp.bfloat16),
                  preferred_element_type=jnp.float32)              # (HID, HW)
    hid = jnp.maximum(hid + b1_ref[...], 0.0)

    # conv2: per-tap accumulating matmuls (M = 2).  No (9*HID, HW) im2col
    # buffer, no store/reload of 9x the hid activation; the extra MXU passes
    # are free because M = 2 leaves the MXU nearly idle anyway.
    acc = jnp.dot(w2_ref[0], tap(hid, 0).astype(jnp.bfloat16),
                  preferred_element_type=jnp.float32)              # (2, HW)
    for t in range(1, 9):
        acc = acc + jnp.dot(w2_ref[t], tap(hid, t).astype(jnp.bfloat16),
                            preferred_element_type=jnp.float32)
    o_ref[...] = acc + b2_ref[...]


def _vmem_limit_bytes(C, hidden, HW):
    """Explicit scoped-VMEM budget sized from the real working set."""
    cin = 2 * C
    blocks = 2 * (2 * (C * HW * 4) + 2 * HW * 4)          # 2x-buffered frame + out blocks
    consts = 2 * (9 * HW * 4 + hidden * 9 * cin * 2 + hidden * 4
                  + 9 * 2 * hidden * 2 + 2 * 4)            # weights/masks (2x-buffered)
    temps = (9 * cin * HW) * (4 + 2) + hidden * HW * (4 + 2) + 2 * HW * 4
    est = blocks + consts + temps
    return int(min(max(4 * est, 16 * 2 ** 20), 48 * 2 ** 20))   # <= v7x headroom


def init_params(key, in_channels, hidden):
    """Deterministic synthetic parameters for the inner flow model."""
    C = in_channels
    cin = 2 * C
    k1, k2, k3, k4 = jax.random.split(key, 4)
    # PyTorch Conv2d layout is (Cout, Cin, 3, 3); pair channels are ordered
    # channel-major [c0f0, c0f1, c1f0, ...] (from the (C,2) flatten).
    w1 = jax.random.normal(k1, (hidden, cin, 3, 3), jnp.float32) * 0.05
    b1 = jax.random.normal(k2, (hidden,), jnp.float32) * 0.05
    w2 = jax.random.normal(k3, (2, hidden, 3, 3), jnp.float32) * 0.05
    b2 = jax.random.normal(k4, (2,), jnp.float32) * 0.05

    # Kernel packings.  In-kernel activations are frame-major
    # [f0c0..f0c_{C-1}, f1c0..], so permute the in-channel axis accordingly,
    # then K-pack the 9 taps: column = ((kh*3+kw)*2 + f)*C + c.
    w1_fc = w1.reshape(hidden, C, 2, 3, 3)                       # (o, c, f, kh, kw)
    w1_k = jnp.transpose(w1_fc, (0, 3, 4, 2, 1)).reshape(hidden, 9 * cin)
    # conv2: one (2, HID) slab per tap, indexed w2_k[kh*3+kw].
    w2_k = jnp.transpose(w2, (2, 3, 0, 1)).reshape(9, 2, hidden)
    return {
        "w1": w1_k.astype(jnp.bfloat16), "b1": b1.reshape(hidden, 1),
        "w2": w2_k.astype(jnp.bfloat16), "b2": b2.reshape(2, 1),
        # PyTorch-layout copies for the plain-JAX reference check.
        "w1_torch": w1, "b1_torch": b1, "w2_torch": w2, "b2_torch": b2,
    }


@jax.jit
def video_flownet_forward(x, params):
    """fast_mode forward.  x: (B, F, C, H, W) -> (B, F-1, 2, H, W)."""
    B, F, C, H, W = x.shape
    if F < 2 or H < 2 or W < 2:
        raise ValueError("VideoFlownet kernel requires F >= 2 and H, W >= 2 "
                         "(roll-wrap masking invariant).")
    HW = H * W
    hidden = params["w1"].shape[0]

    # Frames keep their native layout (free reshape).  Pairing, channel
    # interleave and zero padding all happen inside the kernel — no host-side
    # stack / pad / transpose passes over the video.
    x4 = x.reshape(B, F, C, HW)
    masks = _build_tap_masks(H, W)        # tiny compile-time constant (9, HW)

    kernel = functools.partial(_flow_pair_kernel, H=H, W=W, hidden=hidden)

    # One frame pair per grid step; the two frames of pair (b, j) are fetched
    # by index_maps selecting frame j and frame j+1 of the same array.
    # (Interior frames are DMA'd twice; for single-TC chips several pairs per
    # step would amortize the ~0.35us step overhead — negligible at this size.)
    frame_spec_a = pl.BlockSpec((None, None, C, HW), lambda b, j: (b, j, 0, 0))
    frame_spec_b = pl.BlockSpec((None, None, C, HW), lambda b, j: (b, j + 1, 0, 0))

    def const_spec(a):
        return pl.BlockSpec(a.shape, lambda b, j, _n=a.ndim: (0,) * _n)

    flow = pl.pallas_call(
        kernel,
        out_shape=jax.ShapeDtypeStruct((B, F - 1, 2, HW), jnp.float32),
        grid=(B, F - 1),
        in_specs=[
            frame_spec_a,                 # frame j   of pair (b, j)
            frame_spec_b,                 # frame j+1 of pair (b, j)
            const_spec(masks),
            const_spec(params["w1"]),
            const_spec(params["b1"]),
            const_spec(params["w2"]),
            const_spec(params["b2"]),
        ],
        out_specs=pl.BlockSpec((None, None, 2, HW), lambda b, j: (b, j, 0, 0)),
        compiler_params=pltpu.CompilerParams(
            dimension_semantics=("parallel", "parallel"),   # pairs independent
            vmem_limit_bytes=_vmem_limit_bytes(C, hidden, HW)),
    )(x4, x4, masks, params["w1"], params["b1"], params["w2"], params["b2"])

    return flow.reshape(B, F - 1, 2, H, W)


def _reference_forward(x, params):
    """Plain-JAX (XLA conv) reference with the same bf16 rounding points."""
    B, F, C, H, W = x.shape
    pairs = jnp.stack([x[:, :-1], x[:, 1:]], axis=3).reshape(B * (F - 1), C * 2, H, W)
    w1 = params["w1_torch"].astype(jnp.bfloat16)
    w2 = params["w2_torch"].astype(jnp.bfloat16)
    dn = jax.lax.conv_dimension_numbers(pairs.shape, w1.shape, ("NCHW", "OIHW", "NCHW"))
    h = jax.lax.conv_general_dilated(pairs.astype(jnp.bfloat16), w1, (1, 1),
                                     ((1, 1), (1, 1)), dimension_numbers=dn,
                                     preferred_element_type=jnp.float32)
    h = jnp.maximum(h + params["b1_torch"][None, :, None, None], 0.0)
    dn2 = jax.lax.conv_dimension_numbers(h.shape, w2.shape, ("NCHW", "OIHW", "NCHW"))
    o = jax.lax.conv_general_dilated(h.astype(jnp.bfloat16), w2, (1, 1),
                                     ((1, 1), (1, 1)), dimension_numbers=dn2,
                                     preferred_element_type=jnp.float32)
    o = o + params["b2_torch"][None, :, None, None]
    return o.reshape(B, F - 1, 2, H, W)


if __name__ == "__main__":
    key = jax.random.PRNGKey(0)
    kx, kp = jax.random.split(key)

    B, F, C, H, W = 2, 4, 4, 16, 16
    HIDDEN = 32
    x = jax.random.normal(kx, (B, F, C, H, W), jnp.float32)
    params = init_params(kp, in_channels=C, hidden=HIDDEN)

    out = jax.block_until_ready(video_flownet_forward(x, params))
    assert out.shape == (B, F - 1, 2, H, W), out.shape

    ref = jax.block_until_ready(_reference_forward(x, params))
    max_err = float(jnp.max(jnp.abs(out - ref)))
    assert jnp.allclose(out, ref, rtol=1e-3, atol=1e-3), max_err

    print("KERNEL_OK")
</pallas_src>

<mosaic_0001>
module attributes {stable_mosaic.version = 11 : i64} {
  func.func @_flow_pair_kernel(%arg0: i32, %arg1: i32, %arg2: memref<1x1x4x256xf32, #tpu.memory_space<vmem>>, %arg3: memref<1x1x4x256xf32, #tpu.memory_space<vmem>>, %arg4: memref<9x256xf32, #tpu.memory_space<vmem>>, %arg5: memref<32x72xbf16, #tpu.memory_space<vmem>>, %arg6: memref<32x1xf32, #tpu.memory_space<vmem>>, %arg7: memref<9x2x32xbf16, #tpu.memory_space<vmem>>, %arg8: memref<2x1xf32, #tpu.memory_space<vmem>>, %arg9: memref<1x1x2x256xf32, #tpu.memory_space<vmem>>) attributes {dimension_semantics = [#tpu.dimension_semantics<parallel>, #tpu.dimension_semantics<parallel>], iteration_bounds = array<i64: 2, 3>, scalar_prefetch = 0 : i64, scratch_operands = 0 : i64, tpu.core_type = #tpu.core_type<tc>, window_params = [{transform_indices = @transform_0, window_bounds = array<i64: 1, 1, 4, 256>}, {transform_indices = @transform_1, window_bounds = array<i64: 1, 1, 4, 256>}, {pipeline_mode = #tpu.pipeline_mode<synchronous>, transform_indices = @transform_2, window_bounds = array<i64: 9, 256>}, {pipeline_mode = #tpu.pipeline_mode<synchronous>, transform_indices = @transform_3, window_bounds = array<i64: 32, 72>}, {pipeline_mode = #tpu.pipeline_mode<synchronous>, transform_indices = @transform_4, window_bounds = array<i64: 32, 1>}, {pipeline_mode = #tpu.pipeline_mode<synchronous>, transform_indices = @transform_5, window_bounds = array<i64: 9, 2, 32>}, {pipeline_mode = #tpu.pipeline_mode<synchronous>, transform_indices = @transform_6, window_bounds = array<i64: 2, 1>}, {transform_indices = @transform_7, window_bounds = array<i64: 1, 1, 2, 256>}]} {
    %c0 = arith.constant 0 : index
    %c0_0 = arith.constant 0 : index
    %c0_1 = arith.constant 0 : index
    %c0_2 = arith.constant 0 : index
    %0 = vector.load %arg2[%c0, %c0_0, %c0_1, %c0_2] : memref<1x1x4x256xf32, #tpu.memory_space<vmem>>, vector<1x1x4x256xf32>
    %1 = vector.shape_cast %0 : vector<1x1x4x256xf32> to vector<4x256xf32>
    %c0_3 = arith.constant 0 : index
    %c0_4 = arith.constant 0 : index
    %c0_5 = arith.constant 0 : index
    %c0_6 = arith.constant 0 : index
    %2 = vector.load %arg3[%c0_3, %c0_4, %c0_5, %c0_6] : memref<1x1x4x256xf32, #tpu.memory_space<vmem>>, vector<1x1x4x256xf32>
    %3 = vector.shape_cast %2 : vector<1x1x4x256xf32> to vector<4x256xf32>
    %4 = tpu.concatenate %1, %3 in 0 : vector<4x256xf32>, vector<4x256xf32> -> vector<8x256xf32>
    %c0_7 = arith.constant 0 : index
    %c0_8 = arith.constant 0 : index
    %5 = vector.load %arg4[%c0_7, %c0_8] : memref<9x256xf32, #tpu.memory_space<vmem>>, vector<9x256xf32>
    %c17_i32 = arith.constant 17 : i32
    %6 = tpu.dynamic_rotate %4 by %c17_i32 dim 1 : vector<8x256xf32>, i32 -> vector<8x256xf32>
    %7 = vector.extract_strided_slice %5 {offsets = [0, 0], sizes = [1, 256], strides = [1, 1]} : vector<9x256xf32> to vector<1x256xf32>
    %8 = vector.broadcast %7 : vector<1x256xf32> to vector<8x256xf32>
    %9 = arith.mulf %6, %8 : vector<8x256xf32>
    %c16_i32 = arith.constant 16 : i32
    %10 = tpu.dynamic_rotate %4 by %c16_i32 dim 1 : vector<8x256xf32>, i32 -> vector<8x256xf32>
    %11 = vector.extract_strided_slice %5 {offsets = [1, 0], sizes = [1, 256], strides = [1, 1]} : vector<9x256xf32> to vector<1x256xf32>
    %12 = vector.broadcast %11 : vector<1x256xf32> to vector<8x256xf32>
    %13 = arith.mulf %10, %12 : vector<8x256xf32>
    %c15_i32 = arith.constant 15 : i32
    %14 = tpu.dynamic_rotate %4 by %c15_i32 dim 1 : vector<8x256xf32>, i32 -> vector<8x256xf32>
    %15 = vector.extract_strided_slice %5 {offsets = [2, 0], sizes = [1, 256], strides = [1, 1]} : vector<9x256xf32> to vector<1x256xf32>
    %16 = vector.broadcast %15 : vector<1x256xf32> to vector<8x256xf32>
    %17 = arith.mulf %14, %16 : vector<8x256xf32>
    %c1_i32 = arith.constant 1 : i32
    %18 = tpu.dynamic_rotate %4 by %c1_i32 dim 1 : vector<8x256xf32>, i32 -> vector<8x256xf32>
    %19 = vector.extract_strided_slice %5 {offsets = [3, 0], sizes = [1, 256], strides = [1, 1]} : vector<9x256xf32> to vector<1x256xf32>
    %20 = vector.broadcast %19 : vector<1x256xf32> to vector<8x256xf32>
    %21 = arith.mulf %18, %20 : vector<8x256xf32>
    %22 = vector.extract_strided_slice %5 {offsets = [4, 0], sizes = [1, 256], strides = [1, 1]} : vector<9x256xf32> to vector<1x256xf32>
    %23 = vector.broadcast %22 : vector<1x256xf32> to vector<8x256xf32>
    %24 = arith.mulf %4, %23 : vector<8x256xf32>
    %c255_i32 = arith.constant 255 : i32
    %25 = tpu.dynamic_rotate %4 by %c255_i32 dim 1 : vector<8x256xf32>, i32 -> vector<8x256xf32>
    %26 = vector.extract_strided_slice %5 {offsets = [5, 0], sizes = [1, 256], strides = [1, 1]} : vector<9x256xf32> to vector<1x256xf32>
    %27 = vector.broadcast %26 : vector<1x256xf32> to vector<8x256xf32>
    %28 = arith.mulf %25, %27 : vector<8x256xf32>
    %c241_i32 = arith.constant 241 : i32
    %29 = tpu.dynamic_rotate %4 by %c241_i32 dim 1 : vector<8x256xf32>, i32 -> vector<8x256xf32>
    %30 = vector.extract_strided_slice %5 {offsets = [6, 0], sizes = [1, 256], strides = [1, 1]} : vector<9x256xf32> to vector<1x256xf32>
    %31 = vector.broadcast %30 : vector<1x256xf32> to vector<8x256xf32>
    %32 = arith.mulf %29, %31 : vector<8x256xf32>
    %c240_i32 = arith.constant 240 : i32
    %33 = tpu.dynamic_rotate %4 by %c240_i32 dim 1 : vector<8x256xf32>, i32 -> vector<8x256xf32>
    %34 = vector.extract_strided_slice %5 {offsets = [7, 0], sizes = [1, 256], strides = [1, 1]} : vector<9x256xf32> to vector<1x256xf32>
    %35 = vector.broadcast %34 : vector<1x256xf32> to vector<8x256xf32>
    %36 = arith.mulf %33, %35 : vector<8x256xf32>
    %c239_i32 = arith.constant 239 : i32
    %37 = tpu.dynamic_rotate %4 by %c239_i32 dim 1 : vector<8x256xf32>, i32 -> vector<8x256xf32>
    %38 = vector.extract_strided_slice %5 {offsets = [8, 0], sizes = [1, 256], strides = [1, 1]} : vector<9x256xf32> to vector<1x256xf32>
    %39 = vector.broadcast %38 : vector<1x256xf32> to vector<8x256xf32>
    %40 = arith.mulf %37, %39 : vector<8x256xf32>
    %41 = tpu.concatenate %9, %13, %17, %21, %24, %28, %32, %36, %40 in 0 : vector<8x256xf32>, vector<8x256xf32>, vector<8x256xf32>, vector<8x256xf32>, vector<8x256xf32>, vector<8x256xf32>, vector<8x256xf32>, vector<8x256xf32>, vector<8x256xf32> -> vector<72x256xf32>
    %c0_9 = arith.constant 0 : index
    %c0_10 = arith.constant 0 : index
    %42 = vector.load %arg5[%c0_9, %c0_10] : memref<32x72xbf16, #tpu.memory_space<vmem>>, vector<32x72xbf16>
    %43 = arith.truncf %41 : vector<72x256xf32> to vector<72x256xbf16>
    %cst = arith.constant dense<0.000000e+00> : vector<32x256xf32>
    %44 = tpu.matmul %42, %43, %cst {dimension_numbers = #tpu.dot_dimension_numbers<[1], [0], [0], [1], [0, 0, 1, 1], [], []>} : vector<32x72xbf16>, vector<72x256xbf16>, vector<32x256xf32> -> vector<32x256xf32>
    %c0_11 = arith.constant 0 : index
    %c0_12 = arith.constant 0 : index
    %45 = vector.load %arg6[%c0_11, %c0_12] : memref<32x1xf32, #tpu.memory_space<vmem>>, vector<32x1xf32>
    %46 = vector.broadcast %45 : vector<32x1xf32> to vector<32x256xf32>
    %47 = arith.addf %44, %46 : vector<32x256xf32>
    %cst_13 = arith.constant 0.000000e+00 : f32
    %48 = vector.broadcast %cst_13 : f32 to vector<32x256xf32>
    %49 = arith.maximumf %47, %48 : vector<32x256xf32>
    %c0_14 = arith.constant 0 : index
    %c0_15 = arith.constant 0 : index
    %c0_16 = arith.constant 0 : index
    %50 = vector.load %arg7[%c0_14, %c0_15, %c0_16] : memref<9x2x32xbf16, #tpu.memory_space<vmem>>, vector<1x2x32xbf16>
    %51 = vector.shape_cast %50 : vector<1x2x32xbf16> to vector<2x32xbf16>
    %c17_i32_17 = arith.constant 17 : i32
    %52 = tpu.dynamic_rotate %49 by %c17_i32_17 dim 1 : vector<32x256xf32>, i32 -> vector<32x256xf32>
    %53 = vector.extract_strided_slice %5 {offsets = [0, 0], sizes = [1, 256], strides = [1, 1]} : vector<9x256xf32> to vector<1x256xf32>
    %54 = vector.broadcast %53 : vector<1x256xf32> to vector<32x256xf32>
    %55 = arith.mulf %52, %54 : vector<32x256xf32>
    %56 = arith.truncf %55 : vector<32x256xf32> to vector<32x256xbf16>
    %cst_18 = arith.constant dense<0.000000e+00> : vector<2x256xf32>
    %57 = tpu.matmul %51, %56, %cst_18 {dimension_numbers = #tpu.dot_dimension_numbers<[1], [0], [0], [1], [0, 0, 1, 1], [], []>} : vector<2x32xbf16>, vector<32x256xbf16>, vector<2x256xf32> -> vector<2x256xf32>
    %c1 = arith.constant 1 : index
    %c0_19 = arith.constant 0 : index
    %c0_20 = arith.constant 0 : index
    %58 = vector.load %arg7[%c1, %c0_19, %c0_20] : memref<9x2x32xbf16, #tpu.memory_space<vmem>>, vector<1x2x32xbf16>
    %59 = vector.shape_cast %58 : vector<1x2x32xbf16> to vector<2x32xbf16>
    %c16_i32_21 = arith.constant 16 : i32
    %60 = tpu.dynamic_rotate %49 by %c16_i32_21 dim 1 : vector<32x256xf32>, i32 -> vector<32x256xf32>
    %61 = vector.extract_strided_slice %5 {offsets = [1, 0], sizes = [1, 256], strides = [1, 1]} : vector<9x256xf32> to vector<1x256xf32>
    %62 = vector.broadcast %61 : vector<1x256xf32> to vector<32x256xf32>
    %63 = arith.mulf %60, %62 : vector<32x256xf32>
    %64 = arith.truncf %63 : vector<32x256xf32> to vector<32x256xbf16>
    %cst_22 = arith.constant dense<0.000000e+00> : vector<2x256xf32>
    %65 = tpu.matmul %59, %64, %cst_22 {dimension_numbers = #tpu.dot_dimension_numbers<[1], [0], [0], [1], [0, 0, 1, 1], [], []>} : vector<2x32xbf16>, vector<32x256xbf16>, vector<2x256xf32> -> vector<2x256xf32>
    %66 = arith.addf %57, %65 : vector<2x256xf32>
    %c2 = arith.constant 2 : index
    %c0_23 = arith.constant 0 : index
    %c0_24 = arith.constant 0 : index
    %67 = vector.load %arg7[%c2, %c0_23, %c0_24] : memref<9x2x32xbf16, #tpu.memory_space<vmem>>, vector<1x2x32xbf16>
    %68 = vector.shape_cast %67 : vector<1x2x32xbf16> to vector<2x32xbf16>
    %c15_i32_25 = arith.constant 15 : i32
    %69 = tpu.dynamic_rotate %49 by %c15_i32_25 dim 1 : vector<32x256xf32>, i32 -> vector<32x256xf32>
    %70 = vector.extract_strided_slice %5 {offsets = [2, 0], sizes = [1, 256], strides = [1, 1]} : vector<9x256xf32> to vector<1x256xf32>
    %71 = vector.broadcast %70 : vector<1x256xf32> to vector<32x256xf32>
    %72 = arith.mulf %69, %71 : vector<32x256xf32>
    %73 = arith.truncf %72 : vector<32x256xf32> to vector<32x256xbf16>
    %cst_26 = arith.constant dense<0.000000e+00> : vector<2x256xf32>
    %74 = tpu.matmul %68, %73, %cst_26 {dimension_numbers = #tpu.dot_dimension_numbers<[1], [0], [0], [1], [0, 0, 1, 1], [], []>} : vector<2x32xbf16>, vector<32x256xbf16>, vector<2x256xf32> -> vector<2x256xf32>
    %75 = arith.addf %66, %74 : vector<2x256xf32>
    %c3 = arith.constant 3 : index
    %c0_27 = arith.constant 0 : index
    %c0_28 = arith.constant 0 : index
    %76 = vector.load %arg7[%c3, %c0_27, %c0_28] : memref<9x2x32xbf16, #tpu.memory_space<vmem>>, vector<1x2x32xbf16>
    %77 = vector.shape_cast %76 : vector<1x2x32xbf16> to vector<2x32xbf16>
    %c1_i32_29 = arith.constant 1 : i32
    %78 = tpu.dynamic_rotate %49 by %c1_i32_29 dim 1 : vector<32x256xf32>, i32 -> vector<32x256xf32>
    %79 = vector.extract_strided_slice %5 {offsets = [3, 0], sizes = [1, 256], strides = [1, 1]} : vector<9x256xf32> to vector<1x256xf32>
    %80 = vector.broadcast %79 : vector<1x256xf32> to vector<32x256xf32>
    %81 = arith.mulf %78, %80 : vector<32x256xf32>
    %82 = arith.truncf %81 : vector<32x256xf32> to vector<32x256xbf16>
    %cst_30 = arith.constant dense<0.000000e+00> : vector<2x256xf32>
    %83 = tpu.matmul %77, %82, %cst_30 {dimension_numbers = #tpu.dot_dimension_numbers<[1], [0], [0], [1], [0, 0, 1, 1], [], []>} : vector<2x32xbf16>, vector<32x256xbf16>, vector<2x256xf32> -> vector<2x256xf32>
    %84 = arith.addf %75, %83 : vector<2x256xf32>
    %c4 = arith.constant 4 : index
    %c0_31 = arith.constant 0 : index
    %c0_32 = arith.constant 0 : index
    %85 = vector.load %arg7[%c4, %c0_31, %c0_32] : memref<9x2x32xbf16, #tpu.memory_space<vmem>>, vector<1x2x32xbf16>
    %86 = vector.shape_cast %85 : vector<1x2x32xbf16> to vector<2x32xbf16>
    %87 = vector.extract_strided_slice %5 {offsets = [4, 0], sizes = [1, 256], strides = [1, 1]} : vector<9x256xf32> to vector<1x256xf32>
    %88 = vector.broadcast %87 : vector<1x256xf32> to vector<32x256xf32>
    %89 = arith.mulf %49, %88 : vector<32x256xf32>
    %90 = arith.truncf %89 : vector<32x256xf32> to vector<32x256xbf16>
    %cst_33 = arith.constant dense<0.000000e+00> : vector<2x256xf32>
    %91 = tpu.matmul %86, %90, %cst_33 {dimension_numbers = #tpu.dot_dimension_numbers<[1], [0], [0], [1], [0, 0, 1, 1], [], []>} : vector<2x32xbf16>, vector<32x256xbf16>, vector<2x256xf32> -> vector<2x256xf32>
    %92 = arith.addf %84, %91 : vector<2x256xf32>
    %c5 = arith.constant 5 : index
    %c0_34 = arith.constant 0 : index
    %c0_35 = arith.constant 0 : index
    %93 = vector.load %arg7[%c5, %c0_34, %c0_35] : memref<9x2x32xbf16, #tpu.memory_space<vmem>>, vector<1x2x32xbf16>
    %94 = vector.shape_cast %93 : vector<1x2x32xbf16> to vector<2x32xbf16>
    %c255_i32_36 = arith.constant 255 : i32
    %95 = tpu.dynamic_rotate %49 by %c255_i32_36 dim 1 : vector<32x256xf32>, i32 -> vector<32x256xf32>
    %96 = vector.extract_strided_slice %5 {offsets = [5, 0], sizes = [1, 256], strides = [1, 1]} : vector<9x256xf32> to vector<1x256xf32>
    %97 = vector.broadcast %96 : vector<1x256xf32> to vector<32x256xf32>
    %98 = arith.mulf %95, %97 : vector<32x256xf32>
    %99 = arith.truncf %98 : vector<32x256xf32> to vector<32x256xbf16>
    %cst_37 = arith.constant dense<0.000000e+00> : vector<2x256xf32>
    %100 = tpu.matmul %94, %99, %cst_37 {dimension_numbers = #tpu.dot_dimension_numbers<[1], [0], [0], [1], [0, 0, 1, 1], [], []>} : vector<2x32xbf16>, vector<32x256xbf16>, vector<2x256xf32> -> vector<2x256xf32>
    %101 = arith.addf %92, %100 : vector<2x256xf32>
    %c6 = arith.constant 6 : index
    %c0_38 = arith.constant 0 : index
    %c0_39 = arith.constant 0 : index
    %102 = vector.load %arg7[%c6, %c0_38, %c0_39] : memref<9x2x32xbf16, #tpu.memory_space<vmem>>, vector<1x2x32xbf16>
    %103 = vector.shape_cast %102 : vector<1x2x32xbf16> to vector<2x32xbf16>
    %c241_i32_40 = arith.constant 241 : i32
    %104 = tpu.dynamic_rotate %49 by %c241_i32_40 dim 1 : vector<32x256xf32>, i32 -> vector<32x256xf32>
    %105 = vector.extract_strided_slice %5 {offsets = [6, 0], sizes = [1, 256], strides = [1, 1]} : vector<9x256xf32> to vector<1x256xf32>
    %106 = vector.broadcast %105 : vector<1x256xf32> to vector<32x256xf32>
    %107 = arith.mulf %104, %106 : vector<32x256xf32>
    %108 = arith.truncf %107 : vector<32x256xf32> to vector<32x256xbf16>
    %cst_41 = arith.constant dense<0.000000e+00> : vector<2x256xf32>
    %109 = tpu.matmul %103, %108, %cst_41 {dimension_numbers = #tpu.dot_dimension_numbers<[1], [0], [0], [1], [0, 0, 1, 1], [], []>} : vector<2x32xbf16>, vector<32x256xbf16>, vector<2x256xf32> -> vector<2x256xf32>
    %110 = arith.addf %101, %109 : vector<2x256xf32>
    %c7 = arith.constant 7 : index
    %c0_42 = arith.constant 0 : index
    %c0_43 = arith.constant 0 : index
    %111 = vector.load %arg7[%c7, %c0_42, %c0_43] : memref<9x2x32xbf16, #tpu.memory_space<vmem>>, vector<1x2x32xbf16>
    %112 = vector.shape_cast %111 : vector<1x2x32xbf16> to vector<2x32xbf16>
    %c240_i32_44 = arith.constant 240 : i32
    %113 = tpu.dynamic_rotate %49 by %c240_i32_44 dim 1 : vector<32x256xf32>, i32 -> vector<32x256xf32>
    %114 = vector.extract_strided_slice %5 {offsets = [7, 0], sizes = [1, 256], strides = [1, 1]} : vector<9x256xf32> to vector<1x256xf32>
    %115 = vector.broadcast %114 : vector<1x256xf32> to vector<32x256xf32>
    %116 = arith.mulf %113, %115 : vector<32x256xf32>
    %117 = arith.truncf %116 : vector<32x256xf32> to vector<32x256xbf16>
    %cst_45 = arith.constant dense<0.000000e+00> : vector<2x256xf32>
    %118 = tpu.matmul %112, %117, %cst_45 {dimension_numbers = #tpu.dot_dimension_numbers<[1], [0], [0], [1], [0, 0, 1, 1], [], []>} : vector<2x32xbf16>, vector<32x256xbf16>, vector<2x256xf32> -> vector<2x256xf32>
    %119 = arith.addf %110, %118 : vector<2x256xf32>
    %c8 = arith.constant 8 : index
    %c0_46 = arith.constant 0 : index
    %c0_47 = arith.constant 0 : index
    %120 = vector.load %arg7[%c8, %c0_46, %c0_47] : memref<9x2x32xbf16, #tpu.memory_space<vmem>>, vector<1x2x32xbf16>
    %121 = vector.shape_cast %120 : vector<1x2x32xbf16> to vector<2x32xbf16>
    %c239_i32_48 = arith.constant 239 : i32
    %122 = tpu.dynamic_rotate %49 by %c239_i32_48 dim 1 : vector<32x256xf32>, i32 -> vector<32x256xf32>
    %123 = vector.extract_strided_slice %5 {offsets = [8, 0], sizes = [1, 256], strides = [1, 1]} : vector<9x256xf32> to vector<1x256xf32>
    %124 = vector.broadcast %123 : vector<1x256xf32> to vector<32x256xf32>
    %125 = arith.mulf %122, %124 : vector<32x256xf32>
    %126 = arith.truncf %125 : vector<32x256xf32> to vector<32x256xbf16>
    %cst_49 = arith.constant dense<0.000000e+00> : vector<2x256xf32>
    %127 = tpu.matmul %121, %126, %cst_49 {dimension_numbers = #tpu.dot_dimension_numbers<[1], [0], [0], [1], [0, 0, 1, 1], [], []>} : vector<2x32xbf16>, vector<32x256xbf16>, vector<2x256xf32> -> vector<2x256xf32>
    %128 = arith.addf %119, %127 : vector<2x256xf32>
    %c0_50 = arith.constant 0 : index
    %c0_51 = arith.constant 0 : index
    %129 = vector.load %arg8[%c0_50, %c0_51] : memref<2x1xf32, #tpu.memory_space<vmem>>, vector<2x1xf32>
    %130 = vector.broadcast %129 : vector<2x1xf32> to vector<2x256xf32>
    %131 = arith.addf %128, %130 : vector<2x256xf32>
    %c0_52 = arith.constant 0 : index
    %c0_53 = arith.constant 0 : index
    %c0_54 = arith.constant 0 : index
    %c0_55 = arith.constant 0 : index
    %132 = vector.load %arg9[%c0_52, %c0_53, %c0_54, %c0_55] : memref<1x1x2x256xf32, #tpu.memory_space<vmem>>, vector<1x1x2x256xf32>
    %133 = vector.shape_cast %132 : vector<1x1x2x256xf32> to vector<2x256xf32>
    %134 = vector.shape_cast %131 : vector<2x256xf32> to vector<1x1x2x256xf32>
    tpu.vector_store %arg9[%c0_52, %c0_53, %c0_54, %c0_55], %134 {strides = array<i32>} : memref<1x1x2x256xf32, #tpu.memory_space<vmem>>, vector<1x1x2x256xf32>,
    return
  }
  func.func @transform_0(%arg0: i32, %arg1: i32) -> (i32, i32, i32, i32) {
    %c0_i32 = arith.constant 0 : i32
    %c0_i32_0 = arith.constant 0 : i32
    %c0_i32_1 = arith.constant 0 : i32
    return %arg0, %arg1, %c0_i32, %c0_i32_0 : i32, i32, i32, i32
  }
  func.func @transform_1(%arg0: i32, %arg1: i32) -> (i32, i32, i32, i32) {
    %c1_i32 = arith.constant 1 : i32
    %0 = arith.addi %arg1, %c1_i32 : i32
    %c0_i32 = arith.constant 0 : i32
    %c0_i32_0 = arith.constant 0 : i32
    %c0_i32_1 = arith.constant 0 : i32
    return %arg0, %0, %c0_i32, %c0_i32_0 : i32, i32, i32, i32
  }
  func.func @transform_2(%arg0: i32, %arg1: i32) -> (i32, i32) {
    %c0_i32 = arith.constant 0 : i32
    %c0_i32_0 = arith.constant 0 : i32
    %c0_i32_1 = arith.constant 0 : i32
    return %c0_i32, %c0_i32_0 : i32, i32
  }
  func.func @transform_3(%arg0: i32, %arg1: i32) -> (i32, i32) {
    %c0_i32 = arith.constant 0 : i32
    %c0_i32_0 = arith.constant 0 : i32
    %c0_i32_1 = arith.constant 0 : i32
    return %c0_i32, %c0_i32_0 : i32, i32
  }
  func.func @transform_4(%arg0: i32, %arg1: i32) -> (i32, i32) {
    %c0_i32 = arith.constant 0 : i32
    %c0_i32_0 = arith.constant 0 : i32
    %c0_i32_1 = arith.constant 0 : i32
    return %c0_i32, %c0_i32_0 : i32, i32
  }
  func.func @transform_5(%arg0: i32, %arg1: i32) -> (i32, i32, i32) {
    %c0_i32 = arith.constant 0 : i32
    %c0_i32_0 = arith.constant 0 : i32
    %c0_i32_1 = arith.constant 0 : i32
    %c0_i32_2 = arith.constant 0 : i32
    return %c0_i32, %c0_i32_0, %c0_i32_1 : i32, i32, i32
  }
  func.func @transform_6(%arg0: i32, %arg1: i32) -> (i32, i32) {
    %c0_i32 = arith.constant 0 : i32
    %c0_i32_0 = arith.constant 0 : i32
    %c0_i32_1 = arith.constant 0 : i32
    return %c0_i32, %c0_i32_0 : i32, i32
  }
  func.func @transform_7(%arg0: i32, %arg1: i32) -> (i32, i32, i32, i32) {
    %c0_i32 = arith.constant 0 : i32
    %c0_i32_0 = arith.constant 0 : i32
    %c0_i32_1 = arith.constant 0 : i32
    return %arg0, %arg1, %c0_i32, %c0_i32_0 : i32, i32, i32, i32
  }
}

</mosaic_0001>

<bundles_post_ra>
// kernel: video_flownet_forward.1
= control target key start
LH: loop header
LB: loop body
LE: loop exit
PB: predicated region body
PF: predicated region fallthrough
CT: control target
= control target key end

     0   :  { %s1503_s24 = smov 0   ;;  %s1505_s25 = smov 0   ;;  %s2314_s0 = inlined_call_operand.vmem [shape: f32[2,4,4,256], index: 0, kind: input, shape index: {}, may-alias: {0,1}]   ;;  %s2315_s1 = inlined_call_operand.vmem [shape: f32[2,4,4,256], index: 1, kind: input, shape index: {}, may-alias: {0,1}]   ;;  %s2316_s2 = inlined_call_operand.vmem [shape: f32[9,256], index: 2, kind: input, shape index: {}]   ;;  %s2317_s3 = inlined_call_operand.vmem [shape: bf16[32,72], index: 3, kind: input, shape index: {}]   ;;  %s2318_s4 = inlined_call_operand.vmem [shape: f32[32,1], index: 4, kind: input, shape index: {}]   ;;  %s2319_s5 = inlined_call_operand.vmem [shape: bf16[9,2,32], index: 5, kind: input, shape index: {}]   ;;  %s2320_s6 = inlined_call_operand.vmem [shape: f32[2,1], index: 6, kind: input, shape index: {}]   ;;  %s2321_s7 = inlined_call_operand.vmem [shape: f32[2,3,2,256], index: 7, kind: output, shape index: {}]  }
   0x1   :  { %s1507_s26 = smov 0   ;;  %s1509_s27 = smov 0  }
   0x2   :  { %s1511_s28 = smov 0  }
   0x3 LB: > { %s26_s29 = sadd.s32 1, %s1444_s26  ;;  %s29_s30 = sadd.s32 1, %s1448_s27  ;;  %s1452_s28 = sphi %s1511_s28, %s17_s28   ;;  %s1448_s27 = sphi %s1509_s27, %s2355_s27   ;;  %s1444_s26 = sphi %s1507_s26, %s2354_s26   ;;  %s1440_s25 = sphi %s1505_s25, %s2353_s25   ;;  %s1436_s24 = sphi %s1503_s24, %s2352_s24  }
   0x4   : > { %p27_p0 = scmp.ge.s32.totalorder %s26_s29, 3  ;;  %p1308_p1 = scmp.ge.s32.totalorder %s1452_s28, 1 }
   0x5   : > { %p277_p2 = scmp.lt.s32.totalorder %s1452_s28, 7 }
   0x6   : > { %s2357_s29 = smov (%p27_p0, %s26_s29), 0  ;;  %s2359_s30 = smov (!%p27_p0, %s29_s30), %s1448_s27 }
   0x7   : > { %p278_p3 = pnand %p1308_p1, %p277_p2  ;;  %p31_p4 = scmp.ge.s32.totalorder %s2359_s30, 2 }
   0x9   : > { %s2361_s30 = smov (%p31_p4, %s2359_s30), 0  ;;  %281 = sbr.rel (%p278_p3) target bundleno = 755 (0x2f3), region = 48 }
   0xe   : > { %p327_p5 = scmp.lt.s32.totalorder %s1440_s25, 1  ;;  %p329_p6 = scmp.lt.s32.totalorder %s1436_s24, 3  ;;  %vm372_vm0 = vcmask 1043456   ;;  %v383_v9 = vlaneseq  ;;  %v1590_v14 = vld [vmem:[%s2316_s2] sm:$0xff]  ;;  %v1595_v15 = vld [vmem:[%s2316_s2 + $0x8] sm:$0xff]  ;;  %v489_v53 = vld [vmem:[%s2318_s4 + $0x10] sm:$0xff] }
   0xf   : > { %s336_s8 = sadd.s32 1, %s1436_s24  ;;  %s1454_s23 = smov 113   ;;  %v1603_v16 = vld [vmem:[%s2316_s2 + $0x10] ss:$0 sm:$0xff]  ;;  %v1608_v17 = vld [vmem:[%s2316_s2 + $0x18] ss:$0 sm:$0xff] }
  0x10   : > { %s2363_s25 = smov (!%p327_p5, %s1440_s25), 1  ;;  %p339_p7 = scmp.lt.s32.totalorder %s336_s8, 3  ;;  %v1585_v12 = vand.u32 127, %v383_v9  ;;  %2332 = vst [vmem:[#allocation2_spill] sm:$0xff] %v1603_v16  ;;  %v1611_v18 = vperm.slane %v1590_v14, 7  ;;  %v1614_v19 = vperm.slane %v1595_v15, 7 }
  0x11   : > { %s330_s9 = scalar_select %p329_p6, %s1436_s24, 3  ;;  %2333 = vst [vmem:[#allocation3_spill] sm:$0xff] %v1608_v17  ;;  %v1617_v20 = vperm.slane %v1590_v14, 6  ;;  %v1620_v21 = vperm.slane %v1595_v15, 6  ;;  %v1637_v32 = vperm.slane %v1590_v14, 4  ;;  %v1640_v33 = vperm.slane %v1595_v15, 4 }
  0x12   : > { %s1310_s10 = sshll.u32 %s2363_s25, 3  ;;  %s2365_s8 = smov (!%p339_p7, %s336_s8), 3  ;;  %vm455_vm1 = vcmp.lt.s32.totalorder %v1585_v12, 112  ;;  %vm444_vm2 = vcmp.lt.s32.totalorder %v1585_v12, 113  ;;  %vm466_vm3 = vcmp.lt.s32.totalorder %v1585_v12, 111  ;;  %2334 = vst [vmem:[#allocation4_spill] sm:$0xff] %v1611_v18 }
  0x13   : > { %s1309_s11 = sshll.u32 %s330_s9, 1  ;;  %s1312_s17 = sshll.u32 %s2365_s8, 1  ;;  %2335 = vst [vmem:[#allocation5_spill] sm:$0xff] %v1614_v19  ;;  %vm433_vm4 = vcmp.lt.s32.totalorder %v1585_v12, 127  ;;  %v1650_v43 = vperm.slane %v1590_v14, 5  ;;  %v1653_v44 = vperm.slane %v1595_v15, 5 }
  0x14   : > { %s333_s12 = sadd.s32 %s1310_s10, %s1309_s11  ;;  %s343_s18 = sadd.s32 %s1312_s17, %s1310_s10  ;;  %v487_v54 = vld [vmem:[%s2318_s4] sm:$0xff]  ;;  %v1462_v57 = vmov 0   ;;  %vm418_vm5 = vcmp.lt.s32.totalorder %v1585_v12, 1  ;;  %v1673_v60 = vperm.slane %v1590_v14, 3  ;;  %v1676_v62 = vperm.slane %v1595_v15, 3 }
  0x15   : > { %s1311_s13 = sshll.u32 %s333_s12, 2  ;;  %s1314_s19 = sshll.u32 %s343_s18, 2  ;;  %2336 = vst [vmem:[#allocation6_spill] sm:$0xff] %v1653_v44  ;;  %1411 = vset.pattern.permute.xlu0 %v1462_v57  ;;  %1409 = vset.pattern.permute.xlu1 %v1462_v57  ;;  %vm407_vm6 = vcmp.lt.s32.totalorder %v1585_v12, 15  ;;  %v1680_v63 = vperm.slane %v1590_v14, 2  ;;  %vm385_vm7 = vcmp.lt.s32.totalorder %v1585_v12, 17 }
  0x16   : > { %s335_s16 = scalar_lea.vmem %s2314_s0, %s1311_s13  ;;  %s345_s22 = scalar_lea.vmem %s2315_s1, %s1314_s19  ;;  %1410 = vset.pattern.permute.xlu2 %v1462_v57  ;;  %vm396_vm8 = vcmp.lt.s32.totalorder %v1585_v12, 16  ;;  %vm521_vm9 = vcmask 588800   ;;  %vm655_vm10 = vcmask 261120   ;;  %v1349_v12 = vld [vmem:[%s2319_s5 + $0x7] sm:$0x1]  ;;  %vm1184_vm11 = vcmask 1041408  }
  0x17   : > { %v357_v0 = vld [vmem:[%s335_s16] sm:$0xff]  ;;  %s1455_s8 = smov 111   ;;  %s1456_s9 = smov 112  }
  0x18   : > { %360 = vst [vmem:[#allocation1] ss:$2 sm:$0xff] %v357_v0  ;;  %v358_v1 = vld [vmem:[%s345_s22] sm:$0xff]  ;;  %s1457_s10 = smov 127   ;;  %s1458_s11 = smov 15   ;;  %v1683_v0 = vperm.slane %v1595_v15, 2 }
  0x19   : > { %s1459_s12 = smov 1   ;;  %s1460_s13 = smov 17  }
  0x1a   : > { %s1461_s14 = smov 16   ;;  %p349_p8 = scmp.lt.s32.totalorder %s1436_s24, 2 }
  0x1c   : > { %s2367_s24 = smov (!%p349_p8, %s1436_s24), 2 }
  0x1f   : > { %v361_v2 = vld.sshfl [vmem:[#allocation1] sm:$0xff pattern:$0x75316420]  ;;  %v362_v3 = vld.sshfl [vmem:[#allocation1 + $0x8] sm:$0xff pattern:$0x75316420] }
  0x20   : > { %367 = vst [vmem:[#allocation1 + $0x1] ss:$2 sm:$0xff] %v358_v1 }
  0x27   : > { %v368_v4 = vld.sshfl [vmem:[#allocation1] sm:$0xff pattern:$0x75316420]  ;;  %v369_v6 = vld.sshfl [vmem:[#allocation1 + $0x8] sm:$0xff pattern:$0x75316420] }
  0x28   : > { %v1548_v5 = vsel %vm372_vm0, %v361_v2, %v368_v4  ;;  %v1557_v7 = vsel %vm372_vm0, %v362_v3, %v369_v6 }
  0x29   : > { %440 = vrot.lane.b32.xlu1 %v1548_v5, %s1454_s23  ;;  %462 = vrot.lane.b32.xlu0 %v1548_v5, %s1455_s8  ;;  %v427_v48 = vmul.f32 %v1637_v32, %v1548_v5  ;;  %v428_v49 = vmul.f32 %v1640_v33, %v1557_v7 }
  0x2a   : > { %451 = vrot.lane.b32.xlu2 %v1548_v5, %s1456_s9 }
  0x31   : > { %442 = vrot.lane.b32.xlu1 %v1557_v7, %s1454_s23  ;;  %464 = vrot.lane.b32.xlu0 %v1557_v7, %s1455_s8 }
  0x32   : > { %453 = vrot.lane.b32.xlu2 %v1557_v7, %s1456_s9 }
  0x39   : > { %431 = vrot.lane.b32.xlu1 %v1557_v7, %s1457_s10  ;;  %429 = vrot.lane.b32.xlu0 %v1548_v5, %s1457_s10 }
  0x3a   : > { %403 = vrot.lane.b32.xlu2 %v1548_v5, %s1458_s11 }
  0x41   : > { %414 = vrot.lane.b32.xlu1 %v1548_v5, %s1459_s12  ;;  %405 = vrot.lane.b32.xlu0 %v1557_v7, %s1458_s11 }
  0x42   : > { %416 = vrot.lane.b32.xlu2 %v1557_v7, %s1459_s12 }
  0x49   : > { %381 = vrot.lane.b32.xlu1 %v1557_v7, %s1460_s13  ;;  %379 = vrot.lane.b32.xlu0 %v1548_v5, %s1460_s13 }
  0x4a   : > { %392 = vrot.lane.b32.xlu2 %v1548_v5, %s1461_s14 }
  0x51   : > { %394 = vrot.lane.b32.xlu0 %v1557_v7, %s1461_s14  ;;  %503 = vperm.xlu1 %1409, %v489_v53  }
  0x59   : > { %493 = vperm.xlu0 %1411, %v487_v54  }
  0x84   : > { %v452_v8 = vpop.permute.xlu2 %451 }
  0x8c   : > { %v454_v13 = vpop.permute.xlu2 %453 }
  0x8d   : > { %v456_v24 = vsel %vm455_vm1, %v452_v8, %v454_v13  ;;  %v457_v28 = vsel %vm455_vm1, %v454_v13, %v452_v8 }
  0x8e   : > { %v460_v34 = vmul.f32 %v1611_v18, %v456_v24  ;;  %v461_v39 = vmul.f32 %v1614_v19, %v457_v28  ;;  %v490_v24 = vld [vmem:[%s2318_s4 + $0x18] sm:$0xff] }
  0x8f   : > { %508 = vperm.xlu2 %1410, %v490_v24  }
  0x94   : > { %v404_v38 = vpop.permute.xlu2 %403 }
  0x9b   : > { %v441_v10 = vpop.permute.xlu1 %440  ;;  %v463_v11 = vpop.permute.xlu0 %462 }
  0x9c   : > { %v417_v61 = vpop.permute.xlu2 %416 }
  0xa3   : > { %v443_v22 = vpop.permute.xlu1 %442  ;;  %v465_v23 = vpop.permute.xlu0 %464 }
  0xa4   : > { %v445_v25 = vsel %vm444_vm2, %v441_v10, %v443_v22  ;;  %v467_v26 = vsel %vm466_vm3, %v463_v11, %v465_v23  ;;  %v468_v27 = vsel %vm466_vm3, %v465_v23, %v463_v11  ;;  %v446_v29 = vsel %vm444_vm2, %v443_v22, %v441_v10  ;;  %v488_v23 = vld [vmem:[%s2318_s4 + $0x8] sm:$0xff]  ;;  %v393_v28 = vpop.permute.xlu2 %392 }
  0xa5   : > { %v471_v30 = vmul.f32 %v1603_v16, %v467_v26  ;;  %v472_v31 = vmul.f32 %v1608_v17, %v468_v27  ;;  %v449_v35 = vmul.f32 %v1617_v20, %v445_v25  ;;  %v450_v40 = vmul.f32 %v1620_v21, %v446_v29  ;;  %498 = vperm.xlu1 %1409, %v488_v23  }
  0xa6   : > { %v1705_v26 = vperm.slane %v1590_v14, 0  ;;  %v1708_v27 = vperm.slane %v1595_v15, 0  ;;  %v1712_v29 = vperm.slane %v1590_v14, 1 }
  0xa7   : > { %v485_v36 = vpack.c.bf16 %v471_v30, %v471_v30  ;;  %v486_v37 = vpack.c.bf16 %v472_v31, %v472_v31  ;;  %v483_v47 = vpack.c.bf16 %v460_v34, %v449_v35  ;;  %v484_v52 = vpack.c.bf16 %v461_v39, %v450_v40 }
  0xa8   : > { %v1715_v30 = vperm.slane %v1595_v15, 1 }
  0xa9   : > { %v529_v41 = vsel %vm372_vm0, %v485_v36, 0  ;;  %v532_v42 = vsel %vm372_vm0, %v486_v37, 0 }
  0xaa   : > { %537 = vmatpush.bf16.msra.mxu0 %v529_v41  ;;  %556 = vmatpush.bf16.msra.mxu1 %v532_v42  ;;  %v1357_v42 = vld [vmem:[%s2317_s3] sm:$0xff] }
  0xab   : > { %v432_v45 = vpop.permute.xlu1 %431  ;;  %v430_v46 = vpop.permute.xlu0 %429 }
  0xac   : > { %v434_v50 = vsel %vm433_vm4, %v430_v46, %v432_v45  ;;  %v435_v51 = vsel %vm433_vm4, %v432_v45, %v430_v46  ;;  %v1358_v45 = vld [vmem:[%s2317_s3 + $0x8] sm:$0xff] }
  0xad   : > { %v438_v55 = vmul.f32 %v1650_v43, %v434_v50  ;;  %v439_v56 = vmul.f32 %v1653_v44, %v435_v51 }
  0xae   : > { %538 = vmatpush.bf16.msra.mxu0 %v483_v47  ;;  %557 = vmatpush.bf16.msra.mxu1 %v484_v52 }
  0xaf   : > { %v481_v58 = vpack.c.bf16 %v438_v55, %v427_v48  ;;  %v482_v59 = vpack.c.bf16 %v439_v56, %v428_v49 }
  0xb2   : > { %539 = vmatpush.bf16.msra.mxu0 %v481_v58  ;;  %558 = vmatpush.bf16.msra.mxu1 %v482_v59 }
  0xb3   : > { %v415_v1 = vpop.permute.xlu1 %414  ;;  %v406_v2 = vpop.permute.xlu0 %405 }
  0xb4   : > { %v419_v3 = vsel %vm418_vm5, %v415_v1, %v417_v61  ;;  %v420_v4 = vsel %vm418_vm5, %v417_v61, %v415_v1  ;;  %v408_v5 = vsel %vm407_vm6, %v404_v38, %v406_v2  ;;  %v409_v6 = vsel %vm407_vm6, %v406_v2, %v404_v38 }
  0xb5   : > { %v423_v7 = vmul.f32 %v1673_v60, %v420_v4  ;;  %v424_v8 = vmul.f32 %v1676_v62, %v419_v3  ;;  %v412_v9 = vmul.f32 %v1680_v63, %v409_v6  ;;  %v413_v10 = vmul.f32 %v1683_v0, %v408_v5 }
  0xb7   : > { %v479_v11 = vpack.c.bf16 %v423_v7, %v412_v9  ;;  %v480_v13 = vpack.c.bf16 %v424_v8, %v413_v10 }
  0xb9   : > { %540 = vmatpush.bf16.msra.mxu0 %v479_v11  ;;  %559 = vmatpush.bf16.msra.mxu1 %v480_v13 }
  0xbb   : > { %v380_v22 = vpop.permute.xlu0 %379  ;;  %v382_v25 = vpop.permute.xlu1 %381 }
  0xbc   : > { %v386_v31 = vsel %vm385_vm7, %v380_v22, %v382_v25  ;;  %v387_v34 = vsel %vm385_vm7, %v382_v25, %v380_v22 }
  0xbd   : > { %v390_v38 = vmul.f32 %v1705_v26, %v387_v34  ;;  %v391_v14 = vmul.f32 %v1708_v27, %v386_v31 }
  0xc3   : > { %v395_v35 = vpop.permute.xlu0 %394  ;;  %v504_v51 = vpop.permute.xlu1 %503 }
  0xc4   : > { %v397_v36 = vsel %vm396_vm8, %v393_v28, %v395_v35  ;;  %v398_v37 = vsel %vm396_vm8, %v395_v35, %v393_v28 }
  0xc5   : > { %v401_v15 = vmul.f32 %v1712_v29, %v398_v37  ;;  %v402_v39 = vmul.f32 %v1715_v30, %v397_v36 }
  0xc7   : > { %v477_v40 = vpack.c.bf16 %v401_v15, %v390_v38  ;;  %v478_v41 = vpack.c.bf16 %v402_v39, %v391_v14 }
  0xc9   : > { %541 = vmatpush.bf16.msra.mxu0 %v477_v40  ;;  %560 = vmatpush.bf16.msra.mxu1 %v478_v41 }
  0xcb   : > { %v494_v46 = vpop.permute.xlu0 %493 }
  0xcc   : > { %1325 = vmatmul.msk.bf16.vlgmr.msra.gmra.mxu0 %vm521_vm9, %v1357_v42  ;;  %1327 = vmatmul.msk.bf16.vlgmr.msra.gmra.mxu1 %vm521_vm9, %v1357_v42 }
  0xdc   : > { %1326 = vmatmul.msk.bf16.gmra.mxu0 %vm521_vm9, %v1358_v45  ;;  %1328 = vmatmul.msk.bf16.gmra.mxu1 %vm521_vm9, %v1358_v45 }
  0xe9   : > { %v509_v7 = vpop.permute.xlu2 %508 }
 0x117   : > { %v499_v54 = vpop.permute.xlu1 %498 }
 0x149   : > { %v562_v47 = vpop.f32.mrf.mxu1  ;;  %v543_v48 = vpop.f32.mrf.mxu0 }
 0x14a   : > { %v563_v49 = vadd.f32 %v562_v47, %v494_v46  ;;  %v544_v50 = vadd.f32 %v543_v48, %v494_v46 }
 0x14c   : > { %v1735_v52 = vmax.f32 %v563_v49, 0.0  ;;  %v1737_v53 = vmax.f32 %v544_v50, 0.0 }
 0x14e   : > { %589 = vrot.lane.b32.xlu2 %v1735_v52, %s1460_s13  ;;  %627 = vrot.lane.b32.xlu0 %v1735_v52, %s1461_s14 }
 0x14f   : > { %619 = vrot.lane.b32.xlu1 %v1737_v53, %s1461_s14 }
 0x151   : > { %v545_v55 = vpop.f32.mrf.mxu0  ;;  %v564_v58 = vpop.f32.mrf.mxu1 }
 0x152   : > { %v546_v56 = vadd.f32 %v545_v55, %v499_v54  ;;  %v565_v59 = vadd.f32 %v564_v58, %v499_v54 }
 0x154   : > { %v1751_v57 = vmax.f32 %v546_v56, 0.0  ;;  %v1759_v61 = vmax.f32 %v565_v59, 0.0 }
 0x156   : > { %716 = vrot.lane.b32.xlu2 %v1737_v53, %s1458_s11  ;;  %581 = vrot.lane.b32.xlu0 %v1737_v53, %s1460_s13 }
 0x157   : > { %724 = vrot.lane.b32.xlu1 %v1735_v52, %s1458_s11 }
 0x159   : > { %v548_v1 = vpop.f32.mrf.mxu0  ;;  %v567_v2 = vpop.f32.mrf.mxu1 }
 0x15a   : > { %v549_v3 = vadd.f32 %v548_v1, %v504_v51  ;;  %v568_v4 = vadd.f32 %v567_v2, %v504_v51 }
 0x15c   : > { %v1773_v5 = vmax.f32 %v549_v3, 0.0  ;;  %v1775_v6 = vmax.f32 %v568_v4, 0.0 }
 0x15e   : > { %621 = vrot.lane.b32.xlu2 %v1751_v57, %s1461_s14  ;;  %793 = vrot.lane.b32.xlu0 %v1735_v52, %s1459_s12 }
 0x15f   : > { %785 = vrot.lane.b32.xlu1 %v1737_v53, %s1459_s12 }
 0x161   : > { %v569_v8 = vpop.f32.mrf.mxu1  ;;  %v550_v9 = vpop.f32.mrf.mxu0 }
 0x162   : > { %v570_v10 = vadd.f32 %v569_v8, %v509_v7  ;;  %v551_v11 = vadd.f32 %v550_v9, %v509_v7 }
 0x164   : > { %v1801_v13 = vmax.f32 %v570_v10, 0.0  ;;  %v1803_v22 = vmax.f32 %v551_v11, 0.0 }
 0x166   : > { %726 = vrot.lane.b32.xlu2 %v1759_v61, %s1458_s11  ;;  %591 = vrot.lane.b32.xlu0 %v1759_v61, %s1460_s13 }
 0x167   : > { %629 = vrot.lane.b32.xlu1 %v1759_v61, %s1461_s14 }
 0x16e   : > { %787 = vrot.lane.b32.xlu2 %v1751_v57, %s1459_s12  ;;  %718 = vrot.lane.b32.xlu0 %v1751_v57, %s1458_s11 }
 0x16f   : > { %583 = vrot.lane.b32.xlu1 %v1751_v57, %s1460_s13 }
 0x176   : > { %623 = vrot.lane.b32.xlu2 %v1773_v5, %s1461_s14  ;;  %728 = vrot.lane.b32.xlu0 %v1775_v6, %s1458_s11 }
 0x177   : > { %795 = vrot.lane.b32.xlu1 %v1759_v61, %s1459_s12 }
 0x17e   : > { %631 = vrot.lane.b32.xlu2 %v1775_v6, %s1461_s14  ;;  %789 = vrot.lane.b32.xlu0 %v1773_v5, %s1459_s12 }
 0x17f   : > { %593 = vrot.lane.b32.xlu1 %v1775_v6, %s1460_s13 }
 0x186   : > { %585 = vrot.lane.b32.xlu2 %v1773_v5, %s1460_s13  ;;  %903 = vrot.lane.b32.xlu0 %v1773_v5, %s1457_s10 }
 0x187   : > { %720 = vrot.lane.b32.xlu1 %v1773_v5, %s1458_s11 }
 0x18e   : > { %797 = vrot.lane.b32.xlu2 %v1775_v6, %s1459_s12  ;;  %976 = vrot.lane.b32.xlu0 %v1735_v52, %s1454_s23 }
 0x18f   : > { %980 = vrot.lane.b32.xlu1 %v1775_v6, %s1454_s23 }
 0x196   : > { %972 = vrot.lane.b32.xlu2 %v1773_v5, %s1454_s23  ;;  %633 = vrot.lane.b32.xlu0 %v1801_v13, %s1461_s14 }
 0x197   : > { %625 = vrot.lane.b32.xlu1 %v1803_v22, %s1461_s14 }
 0x19e   : > { %911 = vrot.lane.b32.xlu2 %v1775_v6, %s1457_s10  ;;  %587 = vrot.lane.b32.xlu0 %v1803_v22, %s1460_s13 }
 0x19f   : > { %968 = vrot.lane.b32.xlu1 %v1737_v53, %s1454_s23 }
 0x1a6   : > { %970 = vrot.lane.b32.xlu2 %v1751_v57, %s1454_s23  ;;  %901 = vrot.lane.b32.xlu0 %v1751_v57, %s1457_s10 }
 0x1a7   : > { %978 = vrot.lane.b32.xlu1 %v1759_v61, %s1454_s23 }
 0x1a8   : > { %v590_v23 = vpop.permute.xlu2 %589 }
 0x1ae   : > { %595 = vrot.lane.b32.xlu2 %v1801_v13, %s1460_s13  ;;  %1110 = vrot.lane.b32.xlu0 %v1773_v5, %s1455_s8 }
 0x1af   : > { %907 = vrot.lane.b32.xlu1 %v1735_v52, %s1457_s10 }
 0x1b0   : > { %v717_v24 = vpop.permute.xlu2 %716 }
 0x1b6   : > { %899 = vrot.lane.b32.xlu2 %v1737_v53, %s1457_s10  ;;  %1049 = vrot.lane.b32.xlu0 %v1775_v6, %s1456_s9 }
 0x1b7   : > { %730 = vrot.lane.b32.xlu1 %v1801_v13, %s1458_s11 }
 0x1b8   : > { %v622_v25 = vpop.permute.xlu2 %621 }
 0x1be   : > { %722 = vrot.lane.b32.xlu2 %v1803_v22, %s1458_s11  ;;  %1108 = vrot.lane.b32.xlu0 %v1751_v57, %s1455_s8  ;;  %s1359_s11 = smul.u32 6, %s2363_s25 }
 0x1bf   : > { %1041 = vrot.lane.b32.xlu1 %v1773_v5, %s1456_s9 }
 0x1c0   : > { %v628_v28 = vpop.permute.xlu0 %627  ;;  %v727_v31 = vpop.permute.xlu2 %726 }
 0x1c1   : > { %v620_v34 = vpop.permute.xlu1 %619 }
 0x1c2   : > { %v635_v35 = vsel %vm396_vm8, %v620_v34, %v628_v28  ;;  %v639_v36 = vsel %vm396_vm8, %v628_v28, %v620_v34 }
 0x1c3   : > { %v1888_v56 = vmul.f32 %v639_v36, %v1712_v29  ;;  %v1891_v58 = vmul.f32 %v635_v35, %v1715_v30 }
 0x1c6   : > { %909 = vrot.lane.b32.xlu2 %v1759_v61, %s1457_s10  ;;  %799 = vrot.lane.b32.xlu0 %v1801_v13, %s1459_s12 }
 0x1c7   : > { %791 = vrot.lane.b32.xlu1 %v1803_v22, %s1459_s12  ;;  %s1315_s12 = sshll.u32 %s2367_s24, 1 }
 0x1c8   : > { %v788_v37 = vpop.permute.xlu2 %787  ;;  %v582_v38 = vpop.permute.xlu0 %581  ;;  %s353_s13 = sadd.s32 %s1359_s11, %s1315_s12 }
 0x1c9   : > { %v1853_v14 = vsel %vm385_vm7, %v582_v38, %v590_v23  ;;  %v1857_v15 = vsel %vm385_vm7, %v590_v23, %v582_v38  ;;  %v725_v39 = vpop.permute.xlu1 %724  ;;  %s1316_s14 = sshll.u32 %s353_s13, 1 }
 0x1ca   : > { %v732_v40 = vsel %vm407_vm6, %v717_v24, %v725_v39  ;;  %v736_v41 = vsel %vm407_vm6, %v725_v39, %v717_v24  ;;  %s355_s24 = scalar_lea.vmem %s2321_s7, %s1316_s14 }
 0x1cb   : > { %v1916_v11 = vmul.f32 %v736_v41, %v1680_v63  ;;  %v1919_v23 = vmul.f32 %v732_v40, %v1683_v0 }
 0x1ce   : > { %1118 = vrot.lane.b32.xlu2 %v1775_v6, %s1455_s8  ;;  %974 = vrot.lane.b32.xlu0 %v1803_v22, %s1454_s23 }
 0x1cf   : > { %1114 = vrot.lane.b32.xlu1 %v1735_v52, %s1455_s8 }
 0x1d0   : > { %v1869_v42 = vpop.permute.xlu2 %623  ;;  %v794_v45 = vpop.permute.xlu0 %793 }
 0x1d1   : > { %v786_v46 = vpop.permute.xlu1 %785 }
 0x1d2   : > { %v801_v47 = vsel %vm418_vm5, %v786_v46, %v794_v45  ;;  %v805_v48 = vsel %vm418_vm5, %v794_v45, %v786_v46 }
 0x1d3   : > { %v1944_v40 = vmul.f32 %v805_v48, %v1673_v60  ;;  %v1947_v41 = vmul.f32 %v801_v47, %v1676_v62 }
 0x1d6   : > { %1106 = vrot.lane.b32.xlu2 %v1737_v53, %s1455_s8  ;;  %913 = vrot.lane.b32.xlu0 %v1801_v13, %s1457_s10 }
 0x1d7   : > { %905 = vrot.lane.b32.xlu1 %v1803_v22, %s1457_s10 }
 0x1d8   : > { %v632_v49 = vpop.permute.xlu2 %631  ;;  %v1881_v50 = vpop.permute.xlu0 %591 }
 0x1d9   : > { %v630_v51 = vpop.permute.xlu1 %629 }
 0x1da   : > { %v636_v54 = vsel %vm396_vm8, %v622_v25, %v630_v51  ;;  %v640_v55 = vsel %vm396_vm8, %v630_v51, %v622_v25 }
 0x1db   : > { %v1894_v59 = vmul.f32 %v640_v55, %v1712_v29  ;;  %v1897_v1 = vmul.f32 %v636_v54, %v1715_v30 }
 0x1de   : > { %982 = vrot.lane.b32.xlu2 %v1801_v13, %s1454_s23  ;;  %1037 = vrot.lane.b32.xlu0 %v1737_v53, %s1456_s9 }
 0x1df   : > { %1112 = vrot.lane.b32.xlu1 %v1803_v22, %s1455_s8 }
 0x1e0   : > { %v586_v4 = vpop.permute.xlu2 %585  ;;  %v719_v7 = vpop.permute.xlu0 %718 }
 0x1e1   : > { %v733_v8 = vsel %vm407_vm6, %v719_v7, %v727_v31  ;;  %v737_v9 = vsel %vm407_vm6, %v727_v31, %v719_v7  ;;  %v1913_v10 = vpop.permute.xlu1 %583 }
 0x1e2   : > { %v1922_v24 = vmul.f32 %v737_v9, %v1680_v63  ;;  %v1925_v25 = vmul.f32 %v733_v8, %v1683_v0  ;;  %v1173_v8 = vld [vmem:[%s2320_s6] sm:$0x3] }
 0x1e6   : > { %1116 = vrot.lane.b32.xlu2 %v1759_v61, %s1455_s8  ;;  %1120 = vrot.lane.b32.xlu0 %v1801_v13, %s1455_s8 }
 0x1e7   : > { %1051 = vrot.lane.b32.xlu1 %v1801_v13, %s1456_s9 }
 0x1e8   : > { %v798_v34 = vpop.permute.xlu2 %797  ;;  %v1937_v35 = vpop.permute.xlu0 %728 }
 0x1e9   : > { %v796_v36 = vpop.permute.xlu1 %795 }
 0x1ea   : > { %v802_v38 = vsel %vm418_vm5, %v788_v37, %v796_v36  ;;  %v806_v39 = vsel %vm418_vm5, %v796_v36, %v788_v37 }
 0x1eb   : > { %v1950_v45 = vmul.f32 %v806_v39, %v1673_v60  ;;  %v1953_v46 = vmul.f32 %v802_v38, %v1676_v62 }
 0x1ee   : > { %1043 = vrot.lane.b32.xlu2 %v1803_v22, %s1456_s9  ;;  %1047 = vrot.lane.b32.xlu0 %v1759_v61, %s1456_s9 }
 0x1ef   : > { %1039 = vrot.lane.b32.xlu1 %v1751_v57, %s1456_s9 }
 0x1f0   : > { %v973_v37 = vpop.permute.xlu2 %972  ;;  %v790_v47 = vpop.permute.xlu0 %789 }
 0x1f1   : > { %v1967_v48 = vsel %vm418_vm5, %v790_v47, %v798_v34  ;;  %v1971_v55 = vsel %vm418_vm5, %v798_v34, %v790_v47  ;;  %v594_v7 = vpop.permute.xlu1 %593 }
 0x1f6   : > { %1045 = vrot.lane.b32.xlu2 %v1735_v52, %s1456_s9 }
 0x1f7   : > { %1176 = vperm.xlu1 %1409, %v1173_v8  }
 0x1f8   : > { %v912_v9 = vpop.permute.xlu2 %911  ;;  %v904_v36 = vpop.permute.xlu0 %903 }
 0x1f9   : > { %v1980_v38 = vsel %vm433_vm4, %v904_v36, %v912_v9  ;;  %v1984_v39 = vsel %vm433_vm4, %v912_v9, %v904_v36  ;;  %v1986_v34 = vpop.permute.xlu1 %720  ;;  %v637_v9 = vsel %vm396_vm8, %v1869_v42, %v632_v49  ;;  %v641_v36 = vsel %vm396_vm8, %v632_v49, %v1869_v42 }
 0x1fa   : > { %2337 = vst [vmem:[#allocation7_spill] sm:$0xff] %v1980_v38  ;;  %v648_v17 = vmul.f32 %v637_v9, %v1715_v30  ;;  %v599_v42 = vsel %vm385_vm7, %v586_v4, %v594_v7  ;;  %v603_v49 = vsel %vm385_vm7, %v594_v7, %v586_v4  ;;  %v2339_v7 = vpack.c.bf16 %v1894_v59, %v1888_v56 }
 0x1fb   : > { %2338 = vst [vmem:[#allocation8_spill] sm:$0xff] %v1984_v39  ;;  %v605_v56 = vmul.f32 %v1857_v15, %v1705_v26 }
 0x200   : > { %v1988_v47 = vpop.permute.xlu2 %970  ;;  %v1990_v54 = vpop.permute.xlu0 %976 }
 0x201   : > { %v981_v51 = vpop.permute.xlu1 %980 }
 0x202   : > { %v1994_v8 = vsel %vm444_vm2, %v973_v37, %v981_v51  ;;  %v1998_v31 = vsel %vm444_vm2, %v981_v51, %v973_v37  ;;  %v647_v51 = vmul.f32 %v641_v36, %v1712_v29 }
 0x208   : > { %v596_v28 = vpop.permute.xlu2 %595  ;;  %v634_v3 = vpop.permute.xlu0 %633 }
 0x209   : > { %v626_v2 = vpop.permute.xlu1 %625 }
 0x20a   : > { %v638_v19 = vsel %vm396_vm8, %v626_v2, %v634_v3  ;;  %v642_v18 = vsel %vm396_vm8, %v634_v3, %v626_v2 }
 0x20b   : > { %v649_v37 = vmul.f32 %v642_v18, %v1712_v29  ;;  %v650_v16 = vmul.f32 %v638_v19, %v1715_v30  ;;  %v598_v18 = vsel %vm385_vm7, %v1913_v10, %v1881_v50  ;;  %v609_v29 = vmul.f32 %v603_v49, %v1705_v26 }
 0x20c   : > { %v610_v30 = vmul.f32 %v599_v42, %v1708_v27  ;;  %v608_v36 = vmul.f32 %v598_v18, %v1708_v27 }
 0x20d   : > { %v653_v39 = vpack.c.bf16 %v649_v37, %v647_v51  ;;  %v654_v44 = vpack.c.bf16 %v650_v16, %v648_v17  ;;  %v602_v16 = vsel %vm385_vm7, %v1881_v50, %v1913_v10  ;;  %v2340_v50 = vpack.c.bf16 %v1897_v1, %v1891_v58  ;;  %v1329_v10 = vld [vmem:[%s2319_s5 + $0x1] sm:$0x1] }
 0x20e   : > { %v607_v9 = vmul.f32 %v602_v16, %v1705_v26  ;;  %v606_v58 = vmul.f32 %v1853_v14, %v1708_v27  ;;  %v738_v14 = vsel %vm407_vm6, %v1937_v35, %v1986_v34 }
 0x20f   : > { %665 = vmatpush.bf16.msra.mxu2 %v653_v39  ;;  %678 = vmatpush.bf16.msra.mxu3 %v654_v44 }
 0x210   : > { %v2018_v38 = vpop.permute.xlu2 %899  ;;  %v588_v2 = vpop.permute.xlu0 %587  ;;  %v613_v37 = vpack.c.bf16 %v607_v9, %v605_v56  ;;  %v614_v42 = vpack.c.bf16 %v608_v36, %v606_v58  ;;  %v2341_v56 = vpack.c.bf16 %v1922_v24, %v1916_v11 }
 0x211   : > { %v600_v17 = vsel %vm385_vm7, %v588_v2, %v596_v28  ;;  %v604_v19 = vsel %vm385_vm7, %v596_v28, %v588_v2  ;;  %v2032_v44 = vpop.permute.xlu1 %968 }
 0x212   : > { %v611_v3 = vmul.f32 %v604_v19, %v1705_v26  ;;  %v612_v4 = vmul.f32 %v600_v17, %v1708_v27  ;;  %v580_v26 = vld [vmem:[%s2319_s5] sm:$0x1]  ;;  %v734_v27 = vsel %vm407_vm6, %v1986_v34, %v1937_v35 }
 0x213   : > { %666 = vmatpush.bf16.msra.mxu2 %v2339_v7  ;;  %679 = vmatpush.bf16.msra.mxu3 %v2340_v50  ;;  %v860_v50 = vmul.f32 %v1803_v22, %v1637_v32  ;;  %v856_v22 = vmul.f32 %v1751_v57, %v1637_v32  ;;  %v854_v57 = vmul.f32 %v1737_v53, %v1637_v32 }
 0x214   : > { %v615_v28 = vpack.c.bf16 %v611_v3, %v609_v29  ;;  %v616_v39 = vpack.c.bf16 %v612_v4, %v610_v30  ;;  %v744_v29 = vmul.f32 %v738_v14, %v1680_v63  ;;  %v745_v30 = vmul.f32 %v734_v27, %v1683_v0 }
 0x215   : > { %v862_v11 = vpack.c.bf16 %v856_v22, %v854_v57 }
 0x216   : > { %1330 = vmatmul.msk.bf16.vlgmr.msra.gmra.mxu2 %vm655_vm10, %v1329_v10  ;;  %1331 = vmatmul.msk.bf16.vlgmr.msra.gmra.mxu3 %vm655_vm10, %v1329_v10  ;;  %v861_v10 = vmul.f32 %v1801_v13, %v1640_v33  ;;  %v857_v13 = vmul.f32 %v1759_v61, %v1640_v33  ;;  %v855_v61 = vmul.f32 %v1735_v52, %v1640_v33 }
 0x217   : > { %694 = vmatpush.bf16.msrb.mxu2 %v615_v28  ;;  %707 = vmatpush.bf16.msrb.mxu3 %v616_v39  ;;  %v858_v39 = vmul.f32 %v1773_v5, %v1637_v32  ;;  %v2342_v5 = vpack.c.bf16 %v1925_v25, %v1919_v23  ;;  %v814_v52 = vmul.f32 %v1967_v48, %v1676_v62 }
 0x218   : > { %v723_v59 = vpop.permute.xlu2 %722  ;;  %v2055_v1 = vpop.permute.xlu0 %901  ;;  %v863_v23 = vpack.c.bf16 %v857_v13, %v855_v61  ;;  %v2346_v13 = vld [vmem:[#allocation6_spill] sm:$0xff] }
 0x219   : > { %v2057_v51 = vpop.permute.xlu1 %978 }
 0x21b   : > { %695 = vmatpush.bf16.msrb.mxu2 %v613_v37  ;;  %708 = vmatpush.bf16.msrb.mxu3 %v614_v42 }
 0x220   : > { %v2059_v49 = vpop.permute.xlu0 %1110  ;;  %v2061_v2 = vpop.permute.xlu2 %909 }
 0x221   : > { %v2063_v18 = vpop.permute.xlu1 %907 }
 0x226   : > { %1332 = vmatmul.msk.bf16.vlgmr.msrb.gmra.mxu2 %vm655_vm10, %v580_v26  ;;  %1333 = vmatmul.msk.bf16.vlgmr.msrb.gmra.mxu3 %vm655_vm10, %v580_v26 }
 0x228   : > { %v2078_v15 = vpop.permute.xlu0 %1049  ;;  %v2086_v3 = vpop.permute.xlu2 %1118 }
 0x229   : > { %v731_v16 = vpop.permute.xlu1 %730 }
 0x22a   : > { %v735_v17 = vsel %vm407_vm6, %v723_v59, %v731_v16  ;;  %v739_v19 = vsel %vm407_vm6, %v731_v16, %v723_v59  ;;  %v996_v16 = vmul.f32 %v1994_v8, %v1617_v20  ;;  %v989_v8 = vsel %vm444_vm2, %v2057_v51, %v1988_v47 }
 0x22b   : > { %v746_v4 = vmul.f32 %v739_v19, %v1680_v63  ;;  %v747_v7 = vmul.f32 %v735_v17, %v1683_v0  ;;  %v859_v63 = vmul.f32 %v1775_v6, %v1640_v33  ;;  %v864_v0 = vpack.c.bf16 %v860_v50, %v858_v39  ;;  %v1334_v6 = vld [vmem:[%s2319_s5 + $0x2] sm:$0x1] }
 0x22c   : > { %v813_v33 = vmul.f32 %v1971_v55, %v1673_v60  ;;  %v997_v17 = vmul.f32 %v1998_v31, %v1620_v21  ;;  %v920_v50 = vsel %vm433_vm4, %v2061_v2, %v2055_v1 }
 0x22d   : > { %v750_v35 = vpack.c.bf16 %v746_v4, %v744_v29  ;;  %v751_v34 = vpack.c.bf16 %v747_v7, %v745_v30  ;;  %v865_v36 = vpack.c.bf16 %v861_v10, %v859_v63  ;;  %v2343_v29 = vpack.c.bf16 %v1950_v45, %v1944_v40  ;;  %v1337_v4 = vld [vmem:[%s2319_s5 + $0x3] sm:$0x1] }
 0x22e   : > { %v2344_v30 = vpack.c.bf16 %v1953_v46, %v1947_v41  ;;  %v1340_v41 = vld [vmem:[%s2319_s5 + $0x4] sm:$0x1]  ;;  %v995_v7 = vmul.f32 %v989_v8, %v1620_v21  ;;  %v915_v63 = vsel %vm433_vm4, %v2018_v38, %v2063_v18 }
 0x22f   : > { %761 = vmatpush.bf16.msra.mxu2 %v750_v35  ;;  %774 = vmatpush.bf16.msra.mxu3 %v751_v34 }
 0x230   : > { %v2094_v28 = vpop.permute.xlu0 %1108  ;;  %v2119_v58 = vpop.permute.xlu2 %1106 }
 0x231   : > { %v2100_v9 = vpop.permute.xlu1 %1041 }
 0x233   : > { %762 = vmatpush.bf16.msra.mxu2 %v2341_v56  ;;  %775 = vmatpush.bf16.msra.mxu3 %v2342_v5  ;;  %v2347_v56 = vld [vmem:[#allocation8_spill] sm:$0xff] }
 0x234   : > { %v928_v5 = vmul.f32 %v2347_v56, %v2346_v13 }
 0x236   : > { %1335 = vmatmul.msk.bf16.vlgmr.msra.gmra.mxu2 %vm655_vm10, %v1334_v6  ;;  %1336 = vmatmul.msk.bf16.vlgmr.msra.gmra.mxu3 %vm655_vm10, %v1334_v6 }
 0x237   : > { %875 = vmatpush.bf16.msrb.mxu2 %v864_v0  ;;  %888 = vmatpush.bf16.msrb.mxu3 %v865_v36  ;;  %v919_v0 = vsel %vm433_vm4, %v2063_v18, %v2018_v38  ;;  %v926_v38 = vmul.f32 %v920_v50, %v2346_v13  ;;  %v923_v18 = vmul.f32 %v915_v63, %v1650_v43 }
 0x238   : > { %v800_v24 = vpop.permute.xlu0 %799  ;;  %v983_v27 = vpop.permute.xlu2 %982 }
 0x239   : > { %v792_v25 = vpop.permute.xlu1 %791 }
 0x23a   : > { %v804_v59 = vsel %vm418_vm5, %v792_v25, %v800_v24  ;;  %v808_v32 = vsel %vm418_vm5, %v800_v24, %v792_v25 }
 0x23b   : > { %876 = vmatpush.bf16.msrb.mxu2 %v862_v11  ;;  %889 = vmatpush.bf16.msrb.mxu3 %v863_v23  ;;  %v815_v53 = vmul.f32 %v808_v32, %v1673_v60  ;;  %v816_v37 = vmul.f32 %v804_v59, %v1676_v62  ;;  %v985_v62 = vsel %vm444_vm2, %v1988_v47, %v2057_v51 }
 0x23c   : > { %v984_v47 = vsel %vm444_vm2, %v2032_v44, %v1990_v54  ;;  %v988_v51 = vsel %vm444_vm2, %v1990_v54, %v2032_v44  ;;  %v994_v46 = vmul.f32 %v985_v62, %v1617_v20  ;;  %v916_v44 = vsel %vm433_vm4, %v2055_v1, %v2061_v2  ;;  %v2345_v2 = vld [vmem:[#allocation7_spill] sm:$0xff] }
 0x23d   : > { %v819_v42 = vpack.c.bf16 %v815_v53, %v813_v33  ;;  %v820_v26 = vpack.c.bf16 %v816_v37, %v814_v52  ;;  %v992_v35 = vmul.f32 %v984_v47, %v1617_v20  ;;  %v993_v34 = vmul.f32 %v988_v51, %v1620_v21  ;;  %v1343_v53 = vld [vmem:[%s2319_s5 + $0x5] sm:$0x1] }
 0x23e   : > { %v927_v22 = vmul.f32 %v2345_v2, %v1650_v43  ;;  %v925_v61 = vmul.f32 %v916_v44, %v1650_v43  ;;  %v924_v11 = vmul.f32 %v919_v0, %v2346_v13  ;;  %v1128_v37 = vsel %vm466_vm3, %v2086_v3, %v2059_v49 }
 0x23f   : > { %830 = vmatpush.bf16.msrb.mxu0 %v819_v42  ;;  %843 = vmatpush.bf16.msrb.mxu1 %v820_v26  ;;  %v1001_v39 = vpack.c.bf16 %v995_v7, %v993_v34  ;;  %v1346_v42 = vld [vmem:[%s2319_s5 + $0x6] sm:$0x1]  ;;  %v1055_v26 = vsel %vm455_vm1, %v2100_v9, %v2078_v15 }
 0x240   : > { %v975_v14 = vpop.permute.xlu0 %974  ;;  %v931_v32 = vpack.c.bf16 %v925_v61, %v923_v18  ;;  %v932_v33 = vpack.c.bf16 %v926_v38, %v924_v11 }
 0x241   : > { %v987_v55 = vsel %vm444_vm2, %v975_v14, %v983_v27  ;;  %v991_v60 = vsel %vm444_vm2, %v983_v27, %v975_v14  ;;  %v2141_v48 = vpop.permute.xlu1 %1114  ;;  %v1059_v27 = vsel %vm455_vm1, %v2078_v15, %v2100_v9  ;;  %v2348_v14 = vld [vmem:[#allocation2_spill] sm:$0xff] }
 0x242   : > { %v998_v31 = vmul.f32 %v987_v55, %v1617_v20  ;;  %v999_v19 = vmul.f32 %v991_v60, %v1620_v21  ;;  %v1117_v20 = vpop.permute.xlu2 %1116  ;;  %v1000_v21 = vpack.c.bf16 %v994_v46, %v992_v35  ;;  %v2351_v60 = vld [vmem:[#allocation5_spill] sm:$0xff] }
 0x243   : > { %831 = vmatpush.bf16.msrb.mxu0 %v2343_v29  ;;  %844 = vmatpush.bf16.msrb.mxu1 %v2344_v30  ;;  %v1066_v62 = vmul.f32 %v1059_v27, %v2351_v60  ;;  %v1123_v15 = vsel %vm466_vm3, %v2094_v28, %v1117_v20  ;;  %v1127_v9 = vsel %vm466_vm3, %v1117_v20, %v2094_v28 }
 0x244   : > { %v1002_v40 = vpack.c.bf16 %v998_v31, %v996_v16  ;;  %v1003_v45 = vpack.c.bf16 %v999_v19, %v997_v17  ;;  %v2350_v17 = vld [vmem:[#allocation4_spill] sm:$0xff]  ;;  %v1122_v31 = vsel %vm466_vm3, %v2119_v58, %v2141_v48  ;;  %v1126_v19 = vsel %vm466_vm3, %v2141_v48, %v2119_v58 }
 0x245   : > { %v1065_v55 = vmul.f32 %v1055_v26, %v2350_v17  ;;  %v1130_v46 = vmul.f32 %v2348_v14, %v1122_v31 }
 0x246   : > { %1338 = vmatmul.msk.bf16.vlgmr.msrb.gmra.mxu0 %vm655_vm10, %v1337_v4  ;;  %1339 = vmatmul.msk.bf16.vlgmr.msrb.gmra.mxu1 %vm655_vm10, %v1337_v4 }
 0x247   : > { %1341 = vmatmul.msk.bf16.vlgmr.msrb.gmra.mxu2 %vm655_vm10, %v1340_v41  ;;  %1342 = vmatmul.msk.bf16.vlgmr.msrb.gmra.mxu3 %vm655_vm10, %v1340_v41 }
 0x248   : > { %1013 = vmatpush.bf16.msra.mxu2 %v1002_v40  ;;  %1026 = vmatpush.bf16.msra.mxu3 %v1003_v45  ;;  %v914_v54 = vpop.permute.xlu0 %913  ;;  %v1132_v45 = vmul.f32 %v2348_v14, %v1123_v15 }
 0x249   : > { %v906_v10 = vpop.permute.xlu1 %905 }
 0x24a   : > { %v918_v36 = vsel %vm433_vm4, %v906_v10, %v914_v54  ;;  %v922_v1 = vsel %vm433_vm4, %v914_v54, %v906_v10  ;;  %v1044_v52 = vpop.permute.xlu2 %1043 }
 0x24b   : > { %v929_v6 = vmul.f32 %v918_v36, %v1650_v43  ;;  %v930_v57 = vmul.f32 %v922_v1, %v2346_v13  ;;  %v1124_v43 = vsel %vm466_vm3, %v2059_v49, %v2086_v3  ;;  %v2349_v3 = vld [vmem:[#allocation3_spill] sm:$0xff] }
 0x24c   : > { %1014 = vmatpush.bf16.msra.mxu2 %v1000_v21  ;;  %1027 = vmatpush.bf16.msra.mxu3 %v1001_v39  ;;  %v1134_v49 = vmul.f32 %v2348_v14, %v1124_v43  ;;  %v1135_v16 = vmul.f32 %v2349_v3, %v1128_v37  ;;  %v1133_v58 = vmul.f32 %v2349_v3, %v1127_v9 }
 0x24d   : > { %v933_v23 = vpack.c.bf16 %v929_v6, %v927_v22  ;;  %v934_v24 = vpack.c.bf16 %v930_v57, %v928_v5  ;;  %v1131_v7 = vmul.f32 %v2349_v3, %v1126_v19  ;;  %v1138_v39 = vpack.c.bf16 %v1132_v45, %v1130_v46  ;;  %v1352_v5 = vld [vmem:[%s2319_s5 + $0x8] sm:$0x1] }
 0x24f   : > { %944 = vmatpush.bf16.msra.mxu0 %v933_v23  ;;  %957 = vmatpush.bf16.msra.mxu1 %v934_v24  ;;  %v1139_v63 = vpack.c.bf16 %v1133_v58, %v1131_v7 }
 0x250   : > { %v1038_v25 = vpop.permute.xlu0 %1037 }
 0x251   : > { %v1113_v59 = vpop.permute.xlu1 %1112 }
 0x252   : > { %v1046_v54 = vpop.permute.xlu2 %1045 }
 0x253   : > { %945 = vmatpush.bf16.msra.mxu0 %v931_v32  ;;  %958 = vmatpush.bf16.msra.mxu1 %v932_v33  ;;  %v1053_v20 = vsel %vm455_vm1, %v1038_v25, %v1046_v54  ;;  %v1057_v10 = vsel %vm455_vm1, %v1046_v54, %v1038_v25 }
 0x254   : > { %v1061_v2 = vmul.f32 %v1053_v20, %v2350_v17  ;;  %v1062_v22 = vmul.f32 %v1057_v10, %v2351_v60 }
 0x256   : > { %1344 = vmatmul.msk.bf16.vlgmr.msra.gmra.mxu0 %vm655_vm10, %v1343_v53  ;;  %1345 = vmatmul.msk.bf16.vlgmr.msra.gmra.mxu1 %vm655_vm10, %v1343_v53 }
 0x257   : > { %1347 = vmatmul.msk.bf16.vlgmr.msra.gmra.mxu2 %vm655_vm10, %v1346_v42  ;;  %1348 = vmatmul.msk.bf16.vlgmr.msra.gmra.mxu3 %vm655_vm10, %v1346_v42 }
 0x258   : > { %v1121_v8 = vpop.permute.xlu0 %1120 }
 0x259   : > { %v1125_v29 = vsel %vm466_vm3, %v1113_v59, %v1121_v8  ;;  %v1129_v30 = vsel %vm466_vm3, %v1121_v8, %v1113_v59  ;;  %v1052_v4 = vpop.permute.xlu1 %1051 }
 0x25a   : > { %v1136_v28 = vmul.f32 %v2348_v14, %v1125_v29  ;;  %v1137_v47 = vmul.f32 %v2349_v3, %v1129_v30  ;;  %v1056_v51 = vsel %vm455_vm1, %v1044_v52, %v1052_v4  ;;  %v1060_v40 = vsel %vm455_vm1, %v1052_v4, %v1044_v52 }
 0x25b   : > { %v1067_v48 = vmul.f32 %v1056_v51, %v2350_v17  ;;  %v1068_v41 = vmul.f32 %v1060_v40, %v2351_v60 }
 0x25c   : > { %v1140_v35 = vpack.c.bf16 %v1136_v28, %v1134_v49  ;;  %v1141_v34 = vpack.c.bf16 %v1137_v47, %v1135_v16 }
 0x25d   : > { %v1071_v44 = vpack.c.bf16 %v1067_v48, %v1065_v55  ;;  %v1072_v50 = vpack.c.bf16 %v1068_v41, %v1066_v62 }
 0x25e   : > { %1151 = vmatpush.bf16.msrb.mxu2 %v1140_v35  ;;  %1164 = vmatpush.bf16.msrb.mxu3 %v1141_v34 }
 0x25f   : > { %1082 = vmatpush.bf16.msrb.mxu0 %v1071_v44  ;;  %1095 = vmatpush.bf16.msrb.mxu1 %v1072_v50 }
 0x260   : > { %v1048_v21 = vpop.permute.xlu0 %1047 }
 0x261   : > { %v1040_v0 = vpop.permute.xlu1 %1039 }
 0x262   : > { %v1054_v36 = vsel %vm455_vm1, %v1040_v0, %v1048_v21  ;;  %v1058_v1 = vsel %vm455_vm1, %v1048_v21, %v1040_v0  ;;  %1152 = vmatpush.bf16.msrb.mxu2 %v1138_v39  ;;  %1165 = vmatpush.bf16.msrb.mxu3 %v1139_v63 }
 0x263   : > { %v1063_v13 = vmul.f32 %v1054_v36, %v2350_v17  ;;  %v1064_v56 = vmul.f32 %v1058_v1, %v2351_v60 }
 0x265   : > { %v1069_v6 = vpack.c.bf16 %v1063_v13, %v1061_v2  ;;  %v1070_v57 = vpack.c.bf16 %v1064_v56, %v1062_v22 }
 0x267   : > { %1353 = vmatmul.msk.bf16.vlgmr.msrb.gmra.mxu2 %vm655_vm10, %v1352_v5  ;;  %1354 = vmatmul.msk.bf16.vlgmr.msrb.gmra.mxu3 %vm655_vm10, %v1352_v5 }
 0x268   : > { %1083 = vmatpush.bf16.msrb.mxu0 %v1069_v6  ;;  %1096 = vmatpush.bf16.msrb.mxu1 %v1070_v57 }
 0x269   : > { %v1177_v20 = vpop.permute.xlu1 %1176 }
 0x26b   : > { %1350 = vmatmul.msk.bf16.vlgmr.msrb.gmra.mxu0 %vm655_vm10, %v1349_v12  ;;  %1351 = vmatmul.msk.bf16.vlgmr.msrb.gmra.mxu1 %vm655_vm10, %v1349_v12 }
 0x299   : > { %v668_v61 = vpop.f32.mrf.mxu2  ;;  %v681_v38 = vpop.f32.mrf.mxu3 }
 0x2a1   : > { %v670_v18 = vpop.f32.mrf.mxu2  ;;  %v683_v11 = vpop.f32.mrf.mxu3 }
 0x2a9   : > { %v697_v23 = vpop.f32.mrf.mxu2  ;;  %v710_v24 = vpop.f32.mrf.mxu3 }
 0x2aa   : > { %v698_v9 = vadd.f32 %v697_v23, %v668_v61  ;;  %v711_v8 = vadd.f32 %v710_v24, %v681_v38 }
 0x2b1   : > { %v699_v25 = vpop.f32.mrf.mxu2  ;;  %v712_v59 = vpop.f32.mrf.mxu3 }
 0x2b9   : > { %v764_v32 = vpop.f32.mrf.mxu2  ;;  %v777_v33 = vpop.f32.mrf.mxu3 }
 0x2ba   : > { %v781_v31 = vadd.f32 %v764_v32, %v698_v9  ;;  %v782_v19 = vadd.f32 %v777_v33, %v711_v8 }
 0x2c1   : > { %v766_v52 = vpop.f32.mrf.mxu2  ;;  %v779_v53 = vpop.f32.mrf.mxu3 }
 0x2c3   : > { %v833_v43 = vpop.f32.mrf.mxu0  ;;  %v846_v37 = vpop.f32.mrf.mxu1 }
 0x2c4   : > { %v850_v29 = vadd.f32 %v833_v43, %v781_v31  ;;  %v851_v30 = vadd.f32 %v846_v37, %v782_v19 }
 0x2ca   : > { %v878_v42 = vpop.f32.mrf.mxu2  ;;  %v891_v26 = vpop.f32.mrf.mxu3 }
 0x2cb   : > { %v835_v27 = vpop.f32.mrf.mxu0  ;;  %v848_v14 = vpop.f32.mrf.mxu1  ;;  %v895_v47 = vadd.f32 %v878_v42, %v850_v29  ;;  %v896_v51 = vadd.f32 %v891_v26, %v851_v30 }
 0x2d2   : > { %v880_v49 = vpop.f32.mrf.mxu2  ;;  %v893_v3 = vpop.f32.mrf.mxu3 }
 0x2d3   : > { %v947_v16 = vpop.f32.mrf.mxu0  ;;  %v960_v17 = vpop.f32.mrf.mxu1 }
 0x2d4   : > { %v964_v40 = vadd.f32 %v947_v16, %v895_v47  ;;  %v965_v45 = vadd.f32 %v960_v17, %v896_v51 }
 0x2da   : > { %v1016_v55 = vpop.f32.mrf.mxu2  ;;  %v1029_v60 = vpop.f32.mrf.mxu3 }
 0x2db   : > { %v949_v62 = vpop.f32.mrf.mxu0  ;;  %v962_v15 = vpop.f32.mrf.mxu1  ;;  %v1033_v58 = vadd.f32 %v1016_v55, %v964_v40  ;;  %v1034_v48 = vadd.f32 %v1029_v60, %v965_v45 }
 0x2e2   : > { %v1018_v4 = vpop.f32.mrf.mxu2  ;;  %v1031_v28 = vpop.f32.mrf.mxu3 }
 0x2e8   : > { %v1085_v41 = vpop.f32.mrf.mxu0  ;;  %v1098_v46 = vpop.f32.mrf.mxu1 }
 0x2e9   : > { %v1102_v7 = vadd.f32 %v1085_v41, %v1033_v58  ;;  %v1103_v35 = vadd.f32 %v1098_v46, %v1034_v48 }
 0x2ea   : > { %v1154_v34 = vpop.f32.mrf.mxu2  ;;  %v1167_v54 = vpop.f32.mrf.mxu3 }
 0x2eb   : > { %v1171_v44 = vadd.f32 %v1154_v34, %v1102_v7  ;;  %v1172_v50 = vadd.f32 %v1167_v54, %v1103_v35 }
 0x2ed   : > { %v1180_v10 = vadd.f32 %v1177_v20, %v1172_v50  ;;  %v1179_v21 = vadd.f32 %v1177_v20, %v1171_v44 }
 0x2ef   : > { %v1183_v39 = vrot.slane %v1180_v10, 6 }
 0x2f0   : > { %v1100_v63 = vpop.f32.mrf.mxu1  ;;  %v1087_v0 = vpop.f32.mrf.mxu0 }
 0x2f1   : > { %v1185_v36 = vsel %vm1184_vm11, %v1179_v21, %v1183_v39 }
 0x2f2   : > { %1187 = vst [vmem:[%s355_s24] sm:$0xf] %v1185_v36  ;;  %v1156_v1 = vpop.f32.mrf.mxu2  ;;  %v1169_v2 = vpop.f32.mrf.mxu3 }
 0x2f3 PF: > { %s17_s28 = sadd.s32 1, %s1452_s28   ;;  %s2352_s24 = smov %s1444_s26 }
 0x2f4   : > { %p14_p9 = scmp.ge.s32.totalorder %s17_s28, 8   ;;  %s2353_s25 = smov %s1448_s27 }
 0x2f5   : > { %s2354_s26 = smov %s2357_s29  ;;  %s2355_s27 = smov %s2361_s30 }
 0x2f6   :  { %16 = sbr.rel (!%p14_p9) target bundleno = 3 (0x3), region = 90 }

</bundles_post_ra>
